<compile_context>
chip_gen: v7x
topology: tpu7x:2x2x1
jax: 0.10.0
libtpu: 0.0.40
codegen_flags: <defaults>
</compile_context>

<pallas_src>
import functools
import random

import jax
import jax.numpy as jnp
from jax.experimental import pallas as pl
from jax.experimental.pallas import tpu as pltpu


def _round_up(x, m):
    return (x + m - 1) // m * m


def _pick_tile(dim, gran, cap):
    """Largest tile (multiple of `gran`, <= cap) whose zero-padding waste on
    `dim` is <= 12.5%.  `dim` is already a multiple of `gran`."""
    if dim <= cap:
        return dim
    t = (cap // gran) * gran
    while t > gran:
        waste = (-dim) % t
        if waste * 8 <= dim:          # <= 12.5% padding
            return t
        t -= gran
    return gran                        # always divides (dim is a gran multiple)


def _linear_kernel(x_ref, wt_ref, b_ref, o_ref, acc_ref):
    """One (i, j, k) grid step of  out = x @ W^T + b  (W pre-transposed to [K, N]).

    x_ref: [tm, tk], wt_ref: [tk, tn], b_ref: [1, tn], o_ref: [tm, tn],
    acc_ref: f32 [tm, tn] scratch carried across the k (reduction) axis.
    """
    k = pl.program_id(2)

    @pl.when(k == 0)
    def _init():
        # Fold bias into the accumulator init — no epilogue broadcast + add.
        acc_ref[...] = jnp.broadcast_to(
            b_ref[...].astype(jnp.float32), acc_ref.shape)

    acc_ref[...] += jnp.dot(x_ref[...], wt_ref[...],
                            preferred_element_type=jnp.float32)

    @pl.when(k == pl.num_programs(2) - 1)
    def _finalize():
        o_ref[...] = acc_ref[...].astype(o_ref.dtype)


@functools.partial(jax.jit, static_argnames=("max_tm", "max_tn", "max_tk"))
def _linear_pallas(x, weight, bias, *, max_tm=1024, max_tn=512, max_tk=1024):
    """out = x @ weight.T + bias.

    x:      [M, K]
    weight: [N, K]   (PyTorch nn.Linear layout: [out_features, in_features])
    bias:   [N]
    """
    M, K = x.shape
    N, K2 = weight.shape
    assert K == K2 and bias.shape == (N,)

    itemsize = jnp.dtype(x.dtype).itemsize
    sub = {1: 32, 2: 16}.get(itemsize, 8)      # dtype-aware sublane granularity

    Mr, Kr, Nr = _round_up(M, sub), _round_up(K, 128), _round_up(N, 128)

    # tm is the dominant lever: weight HBM traffic scales as ceil(M/tm)*N*K.
    tm = _pick_tile(Mr, sub, max_tm)
    tn = _pick_tile(Nr, 128, max_tn)
    tk = _pick_tile(Kr, 128, max_tk)

    M_pad = _round_up(Mr, tm)
    N_pad = _round_up(Nr, tn)
    K_pad = _round_up(Kr, tk)

    # Double-buffered inputs/outputs + f32 accumulator, kept under ~40 MiB so
    # the config ports to v7x (64 MiB VMEM per TensorCore).
    def footprint(tm_, tn_, tk_):
        return (2 * (tm_ * tk_ + tk_ * tn_ + tn_ + tm_ * tn_) * itemsize
                + tm_ * tn_ * 4)

    budget = 40 * 1024 * 1024
    while footprint(tm, tn, tk) > budget and tk > 128 and (tk // 2) % 128 == 0:
        tk //= 2
    while footprint(tm, tn, tk) > budget and tn > 128 and (tn // 2) % 128 == 0:
        tn //= 2
    while footprint(tm, tn, tk) > budget and tm > sub and (tm // 2) % sub == 0:
        tm //= 2

    # Guarantee >= 2 parallel (i, j) grid steps so both TensorCores of a
    # dual-core chip (v7x) get work.  Prefer splitting N (keeps grid_i == 1,
    # weight streamed once).
    if (M_pad // tm) * (N_pad // tn) == 1:
        if N_pad >= 256:
            tn = N_pad // 2 if (N_pad // 2) % 128 == 0 else 128
        elif M_pad >= 2 * sub:
            half = M_pad // 2
            tm = half if half % sub == 0 else sub

    grid = (M_pad // tm, N_pad // tn, K_pad // tk)

    # Zero-pad (padding contributes 0 to the dot) and pre-transpose the weight
    # ONCE to [K, N] so the kernel contracts ((1,),(0,)) — guaranteed native
    # MXU matmul, no per-tile transpose.
    if (M_pad, K_pad) != (M, K):
        x = jnp.pad(x, ((0, M_pad - M), (0, K_pad - K)))
    w = weight
    if (N_pad, K_pad) != (N, K):
        w = jnp.pad(w, ((0, N_pad - N), (0, K_pad - K)))
    w_t = w.T                                   # [K_pad, N_pad]
    b2 = bias
    if N_pad != N:
        b2 = jnp.pad(b2, (0, N_pad - N))
    b2 = b2.reshape(1, N_pad)

    vmem_limit = int(min(48 * 1024 * 1024,
                         max(32 * 1024 * 1024,
                             footprint(tm, tn, tk) + 4 * 1024 * 1024)))

    # Bytes account for re-streaming: x once per j-tile, weight once per i-tile.
    cost = pl.CostEstimate(
        flops=2 * M_pad * N_pad * K_pad,
        transcendentals=0,
        bytes_accessed=itemsize * (M_pad * K_pad * grid[1]
                                   + K_pad * N_pad * grid[0]
                                   + M_pad * N_pad + N_pad),
    )

    out = pl.pallas_call(
        _linear_kernel,
        out_shape=jax.ShapeDtypeStruct((M_pad, N_pad), x.dtype),
        grid_spec=pltpu.PrefetchScalarGridSpec(
            num_scalar_prefetch=0,
            grid=grid,
            in_specs=[
                pl.BlockSpec((tm, tk), lambda i, j, k: (i, k)),   # x
                pl.BlockSpec((tk, tn), lambda i, j, k: (k, j)),   # W^T [K, N]
                pl.BlockSpec((1, tn), lambda i, j, k: (0, j)),    # bias
            ],
            out_specs=pl.BlockSpec((tm, tn), lambda i, j, k: (i, j)),
            scratch_shapes=[pltpu.VMEM((tm, tn), jnp.float32)],
        ),
        compiler_params=pltpu.CompilerParams(
            dimension_semantics=("parallel", "parallel", "arbitrary"),
            vmem_limit_bytes=vmem_limit,
        ),
        cost_estimate=cost,
    )(x, w_t, b2)

    if (M_pad, N_pad) != (M, N):
        out = out[:M, :N]
    return out


def stochastic_linear(x, weight, bias, *, p=0.5, training=False, rng=random):
    """Pallas equivalent of Stochastic(nn.Linear(K, N), p=p)(x).

    The gate is a host-side Python decision (exactly mirroring the PyTorch
    module's `random.random()` branch) and therefore stays OUTSIDE jit; the
    apply path (_linear_pallas) is jitted so repeated module applications hit
    the compilation cache with no eager dispatch overhead.
    """
    apply_module = (rng.random() <= p) or training
    if not apply_module:
        # PyTorch returns `args` (the inputs) unchanged; single-tensor usage
        # here, so return x itself — zero device cost.
        return x
    return _linear_pallas(x, weight, bias)


if __name__ == "__main__":
    random.seed(0)
    key = jax.random.PRNGKey(0)
    kx, kw, kb, kx2, kw2, kb2 = jax.random.split(key, 6)

    # --- Case 1: training=True, small non-aligned shapes (exercise padding) ---
    M, K, N = 70, 320, 200
    x = jax.random.normal(kx, (M, K), dtype=jnp.float32)
    w = jax.random.normal(kw, (N, K), dtype=jnp.float32) * 0.05
    b = jax.random.normal(kb, (N,), dtype=jnp.float32) * 0.1
    ref = jnp.dot(x, w.T, precision=jax.lax.Precision.HIGHEST) + b[None, :]

    out_train = stochastic_linear(x, w, b, p=0.5, training=True)
    out_train = jax.block_until_ready(out_train)
    assert out_train.shape == (M, N)
    assert jnp.allclose(out_train, ref, atol=1e-3, rtol=1e-3)

    # --- Case 2: force a multi-tile grid (2, 2, 4) via small tile caps, so
    #     the accumulator init / K-reduction / finalize path is exercised. ---
    M2, K2, N2 = 64, 512, 256
    x2 = jax.random.normal(kx2, (M2, K2), dtype=jnp.float32)
    w2 = jax.random.normal(kw2, (N2, K2), dtype=jnp.float32) * 0.05
    b2 = jax.random.normal(kb2, (N2,), dtype=jnp.float32) * 0.1
    ref2 = jnp.dot(x2, w2.T, precision=jax.lax.Precision.HIGHEST) + b2[None, :]
    out2 = _linear_pallas(x2, w2, b2, max_tm=32, max_tn=128, max_tk=128)
    out2 = jax.block_until_ready(out2)
    assert jnp.allclose(out2, ref2, atol=1e-3, rtol=1e-3)

    # --- Case 3: eval-mode gate mirrors the PyTorch module's host-side branch ---
    gate_rng = random.Random(123)
    probe = random.Random(123)
    expected_apply = probe.random() <= 0.5
    out_eval = stochastic_linear(x, w, b, p=0.5, training=False, rng=gate_rng)
    out_eval = jax.block_until_ready(out_eval)
    ref_eval = ref if expected_apply else x
    assert jnp.allclose(out_eval, ref_eval, atol=1e-3, rtol=1e-3)

    # --- Case 4: forced passthrough (p=0, eval) -> returns x, no kernel launch ---
    out_pass = stochastic_linear(x, w, b, p=0.0, training=False,
                                 rng=random.Random(7))
    out_pass = jax.block_until_ready(out_pass)
    assert jnp.allclose(out_pass, x)

    print("KERNEL_OK")
</pallas_src>

<mosaic_0001>
module attributes {stable_mosaic.version = 11 : i64} {
  func.func @_linear_kernel(%arg0: i32, %arg1: i32, %arg2: i32, %arg3: memref<72x384xf32, #tpu.memory_space<vmem>>, %arg4: memref<384x128xf32, #tpu.memory_space<vmem>>, %arg5: memref<1x128xf32, #tpu.memory_space<vmem>>, %arg6: memref<72x128xf32, #tpu.memory_space<vmem>>, %arg7: memref<72x128xf32, #tpu.memory_space<vmem>>) attributes {dimension_semantics = [#tpu.dimension_semantics<parallel>, #tpu.dimension_semantics<parallel>, #tpu.dimension_semantics<arbitrary>], iteration_bounds = array<i64: 1, 2, 1>, scalar_prefetch = 0 : i64, scratch_operands = 1 : i64, tpu.core_type = #tpu.core_type<tc>, window_params = [{transform_indices = @transform_0, window_bounds = array<i64: 72, 384>}, {transform_indices = @transform_1, window_bounds = array<i64: 384, 128>}, {transform_indices = @transform_2, window_bounds = array<i64: 1, 128>}, {transform_indices = @transform_3, window_bounds = array<i64: 72, 128>}]} {
    %c0_i32 = arith.constant 0 : i32
    %0 = arith.cmpi eq, %arg2, %c0_i32 : i32
    %1 = arith.extui %0 : i1 to i32
    %c0_i32_0 = arith.constant 0 : i32
    %2 = arith.cmpi ne, %1, %c0_i32_0 : i32
    scf.if %2 {
      %c0_10 = arith.constant 0 : index
      %c0_11 = arith.constant 0 : index
      %12 = vector.load %arg5[%c0_10, %c0_11] : memref<1x128xf32, #tpu.memory_space<vmem>>, vector<1x128xf32>
      %13 = vector.shape_cast %12 : vector<1x128xf32> to vector<1x128xf32>
      %14 = vector.broadcast %13 : vector<1x128xf32> to vector<72x128xf32>
      %c0_12 = arith.constant 0 : index
      %c0_13 = arith.constant 0 : index
      %15 = vector.load %arg7[%c0_12, %c0_13] : memref<72x128xf32, #tpu.memory_space<vmem>>, vector<72x128xf32>
      tpu.vector_store %arg7[%c0_12, %c0_13], %14 {strides = array<i32>} : memref<72x128xf32, #tpu.memory_space<vmem>>, vector<72x128xf32>,
    } else {
    }
    %c0 = arith.constant 0 : index
    %c0_1 = arith.constant 0 : index
    %3 = vector.load %arg7[%c0, %c0_1] : memref<72x128xf32, #tpu.memory_space<vmem>>, vector<72x128xf32>
    %c0_2 = arith.constant 0 : index
    %c0_3 = arith.constant 0 : index
    %4 = vector.load %arg3[%c0_2, %c0_3] : memref<72x384xf32, #tpu.memory_space<vmem>>, vector<72x384xf32>
    %c0_4 = arith.constant 0 : index
    %c0_5 = arith.constant 0 : index
    %5 = vector.load %arg4[%c0_4, %c0_5] : memref<384x128xf32, #tpu.memory_space<vmem>>, vector<384x128xf32>
    %cst = arith.constant dense<0.000000e+00> : vector<72x128xf32>
    %6 = tpu.matmul %4, %5, %cst {dimension_numbers = #tpu.dot_dimension_numbers<[1], [0], [0], [1], [0, 0, 1, 1], [], []>} : vector<72x384xf32>, vector<384x128xf32>, vector<72x128xf32> -> vector<72x128xf32>
    %7 = arith.addf %3, %6 : vector<72x128xf32>
    %c0_6 = arith.constant 0 : index
    %c0_7 = arith.constant 0 : index
    %8 = vector.load %arg7[%c0_6, %c0_7] : memref<72x128xf32, #tpu.memory_space<vmem>>, vector<72x128xf32>
    tpu.vector_store %arg7[%c0_6, %c0_7], %7 {strides = array<i32>} : memref<72x128xf32, #tpu.memory_space<vmem>>, vector<72x128xf32>,
    %c0_i32_8 = arith.constant 0 : i32
    %9 = arith.cmpi eq, %arg2, %c0_i32_8 : i32
    %10 = arith.extui %9 : i1 to i32
    %c0_i32_9 = arith.constant 0 : i32
    %11 = arith.cmpi ne, %10, %c0_i32_9 : i32
    scf.if %11 {
      %c0_10 = arith.constant 0 : index
      %c0_11 = arith.constant 0 : index
      %12 = vector.load %arg7[%c0_10, %c0_11] : memref<72x128xf32, #tpu.memory_space<vmem>>, vector<72x128xf32>
      %c0_12 = arith.constant 0 : index
      %c0_13 = arith.constant 0 : index
      %13 = vector.load %arg6[%c0_12, %c0_13] : memref<72x128xf32, #tpu.memory_space<vmem>>, vector<72x128xf32>
      tpu.vector_store %arg6[%c0_12, %c0_13], %12 {strides = array<i32>} : memref<72x128xf32, #tpu.memory_space<vmem>>, vector<72x128xf32>,
    } else {
    }
    return
  }
  func.func @transform_0(%arg0: i32, %arg1: i32, %arg2: i32) -> (i32, i32) {
    %c0_i32 = arith.constant 0 : i32
    return %arg0, %arg2 : i32, i32
  }
  func.func @transform_1(%arg0: i32, %arg1: i32, %arg2: i32) -> (i32, i32) {
    %c0_i32 = arith.constant 0 : i32
    return %arg2, %arg1 : i32, i32
  }
  func.func @transform_2(%arg0: i32, %arg1: i32, %arg2: i32) -> (i32, i32) {
    %c0_i32 = arith.constant 0 : i32
    %c0_i32_0 = arith.constant 0 : i32
    return %c0_i32, %arg1 : i32, i32
  }
  func.func @transform_3(%arg0: i32, %arg1: i32, %arg2: i32) -> (i32, i32) {
    %c0_i32 = arith.constant 0 : i32
    return %arg0, %arg1 : i32, i32
  }
}

</mosaic_0001>

<bundles_post_ra>
// kernel: _linear_pallas.1
= control target key start
LH: loop header
LB: loop body
LE: loop exit
PB: predicated region body
PF: predicated region fallthrough
CT: control target
= control target key end

     0   :  { %8 = vsyncpa [#allocation5], 0  ;;  %s1756_s0 = inlined_call_operand.vmem [shape: f32[72,384], index: 0, kind: input, shape index: {}]   ;;  %s1757_s1 = inlined_call_operand.vmem [shape: f32[384,256], index: 1, kind: input, shape index: {}]   ;;  %s1758_s2 = inlined_call_operand.vmem [shape: f32[1,256], index: 2, kind: input, shape index: {}]   ;;  %s1759_s3 = inlined_call_operand.hbm [shape: f32[72,256], index: 3, kind: output, shape index: {}]  }
   0x1   :  { %10 = vsyncpa [#allocation5 + $0x1], 0  ;;  %s1347_s12 = smov 0   ;;  %s1349_s13 = smov 0  }
   0x2   :  { %s1351_s14 = smov 0   ;;  %s1353_s15 = smov 0  }
   0x3   :  { %s1355_s16 = smov 0   ;;  %s1357_s17 = smov 0  }
   0x4 LB: > { %s966_s18 = sadd.s32 4294967295, %s1318_s17   ;;  %s967_s19 = sadd.s32 4294967294, %s1318_s17   ;;  %s1318_s17 = sphi %s1357_s17, %s16_s17   ;;  %s1314_s16 = sphi %s1355_s16, %s1766_s16   ;;  %s1310_s15 = sphi %s1353_s15, %s1765_s15   ;;  %s1306_s14 = sphi %s1351_s14, %s1764_s14   ;;  %s1302_s13 = sphi %s1349_s13, %s1763_s13   ;;  %s1298_s12 = sphi %s1347_s12, %s1762_s12  }
   0x5   : > { %s31_s20 = sadd.s32 1, %s1314_s16  ;;  %s72_s21 = sadd.s32 1, %s1306_s14 }
   0x6   : > { %p33_p0 = scmp.ge.s32.totalorder %s31_s20, 2  ;;  %p79_p1 = scmp.ne.s32.totalorder %s1306_s14, %s1302_s13 }
   0x7   : > { %p80_p2 = scmp.eq.s32.totalorder %s1318_s17, 0  ;;  %p137_p3 = scmp.eq.s32.totalorder %s966_s18, 1 }
   0x8   : > { %s1768_s20 = smov (%p33_p0, %s31_s20), 0  ;;  %p142_p6 = scmp.ne.s32.totalorder %s1302_s13, %s1298_s12 }
   0x9   : > { %p81_p4 = por %p80_p2, %p79_p1  ;;  %p1386_p5 = por %p137_p3, %p79_p1 }
   0xa   : > { %s68_s23 = ssub.s32 %s1314_s16, %s1768_s20  ;;  %p143_p8 = scmp.eq.s32.totalorder %s967_s19, 1 }
   0xb   : > { %p70_p7 = scmp.eq.s32.totalorder %s68_s23, 0  ;;  %p970_p10 = scmp.ge.s32.totalorder %s1318_s17, 2 }
   0xc   : > { %p1397_p9 = por %p143_p8, %p142_p6 }
   0xd   : > { %s1395_s24 = scalar_select %p70_p7, %s1306_s14, %s72_s21  }
   0xe   : > { %174 = sbr.rel (%p970_p10) target bundleno = 49 (0x31), region = 20 }
  0x15   : > { %177 = sbr.rel (!%p81_p4) target bundleno = 49 (0x31), region = 24  ;;  %s179_s26 = sand.u32 (%p81_p4), 1, %s1306_s14  }
  0x16   : > { %s971_s27 = sshll.u32 (%p81_p4), %s1314_s16, 3  ;;  %s1176_s28 = smul.u32 (%p81_p4), 384, %s179_s26 }
  0x17   : > { %s1409_s4 = scalar_lea.vmem (%p81_p4), %s1757_s1, %s971_s27 }
  0x18   : > { %v308_v0 = vld [vmem:[%s1409_s4] sm:$0xff] (%p81_p4)  ;;  %v310_v1 = vld [vmem:[%s1409_s4 + $0x10] sm:$0xff] (%p81_p4)  ;;  %s1417_s5 = scalar_lea.vmem (%p81_p4), [#allocation3], %s1176_s28 }
  0x19   : > { %v312_v2 = vld [vmem:[%s1409_s4 + $0x20] sm:$0xff] (%p81_p4)  ;;  %v314_v3 = vld [vmem:[%s1409_s4 + $0x30] sm:$0xff] (%p81_p4)  ;;  %309 = vst [vmem:[%s1417_s5] sm:$0xff] (%p81_p4), %v308_v0  ;;  %311 = vst [vmem:[%s1417_s5 + $0x8] sm:$0xff] (%p81_p4), %v310_v1 }
  0x1a   : > { %v316_v4 = vld [vmem:[%s1409_s4 + $0x40] sm:$0xff] (%p81_p4)  ;;  %v318_v5 = vld [vmem:[%s1409_s4 + $0x50] sm:$0xff] (%p81_p4)  ;;  %313 = vst [vmem:[%s1417_s5 + $0x10] sm:$0xff] (%p81_p4), %v312_v2  ;;  %315 = vst [vmem:[%s1417_s5 + $0x18] sm:$0xff] (%p81_p4), %v314_v3 }
  0x1b   : > { %317 = vst [vmem:[%s1417_s5 + $0x20] sm:$0xff] (%p81_p4), %v316_v4  ;;  %319 = vst [vmem:[%s1417_s5 + $0x28] sm:$0xff] (%p81_p4), %v318_v5  ;;  %v320_v6 = vld [vmem:[%s1409_s4 + $0x60] sm:$0xff] (%p81_p4)  ;;  %v322_v7 = vld [vmem:[%s1409_s4 + $0x70] sm:$0xff] (%p81_p4) }
  0x1c   : > { %v324_v8 = vld [vmem:[%s1409_s4 + $0x80] sm:$0xff]  ;;  %321 = vst [vmem:[%s1417_s5 + $0x30] sm:$0xff] %v320_v6  ;;  %323 = vst [vmem:[%s1417_s5 + $0x38] sm:$0xff] %v322_v7  ;;  %v326_v9 = vld [vmem:[%s1409_s4 + $0x90] sm:$0xff] }
  0x1d   : > { %325 = vst [vmem:[%s1417_s5 + $0x40] sm:$0xff] %v324_v8  ;;  %v328_v10 = vld [vmem:[%s1409_s4 + $0xa0] sm:$0xff]  ;;  %v330_v11 = vld [vmem:[%s1409_s4 + $0xb0] sm:$0xff]  ;;  %327 = vst [vmem:[%s1417_s5 + $0x48] sm:$0xff] %v326_v9 }
  0x1e   : > { %329 = vst [vmem:[%s1417_s5 + $0x50] sm:$0xff] %v328_v10  ;;  %331 = vst [vmem:[%s1417_s5 + $0x58] sm:$0xff] %v330_v11  ;;  %v332_v12 = vld [vmem:[%s1409_s4 + $0xc0] sm:$0xff]  ;;  %v334_v13 = vld [vmem:[%s1409_s4 + $0xd0] sm:$0xff] }
  0x1f   : > { %v336_v14 = vld [vmem:[%s1409_s4 + $0xe0] sm:$0xff]  ;;  %333 = vst [vmem:[%s1417_s5 + $0x60] sm:$0xff] %v332_v12  ;;  %335 = vst [vmem:[%s1417_s5 + $0x68] sm:$0xff] %v334_v13  ;;  %v338_v15 = vld [vmem:[%s1409_s4 + $0xf0] sm:$0xff] }
  0x20   : > { %337 = vst [vmem:[%s1417_s5 + $0x70] sm:$0xff] %v336_v14  ;;  %v340_v16 = vld [vmem:[%s1409_s4 + $0x100] sm:$0xff]  ;;  %v342_v17 = vld [vmem:[%s1409_s4 + $0x110] sm:$0xff]  ;;  %339 = vst [vmem:[%s1417_s5 + $0x78] sm:$0xff] %v338_v15 }
  0x21   : > { %341 = vst [vmem:[%s1417_s5 + $0x80] sm:$0xff] %v340_v16  ;;  %343 = vst [vmem:[%s1417_s5 + $0x88] sm:$0xff] %v342_v17  ;;  %v344_v18 = vld [vmem:[%s1409_s4 + $0x120] sm:$0xff]  ;;  %v346_v19 = vld [vmem:[%s1409_s4 + $0x130] sm:$0xff] }
  0x22   : > { %v348_v20 = vld [vmem:[%s1409_s4 + $0x140] sm:$0xff]  ;;  %345 = vst [vmem:[%s1417_s5 + $0x90] sm:$0xff] %v344_v18  ;;  %347 = vst [vmem:[%s1417_s5 + $0x98] sm:$0xff] %v346_v19  ;;  %v350_v21 = vld [vmem:[%s1409_s4 + $0x150] sm:$0xff] }
  0x23   : > { %349 = vst [vmem:[%s1417_s5 + $0xa0] sm:$0xff] %v348_v20  ;;  %v352_v22 = vld [vmem:[%s1409_s4 + $0x160] sm:$0xff]  ;;  %v354_v23 = vld [vmem:[%s1409_s4 + $0x170] sm:$0xff]  ;;  %351 = vst [vmem:[%s1417_s5 + $0xa8] sm:$0xff] %v350_v21 }
  0x24   : > { %353 = vst [vmem:[%s1417_s5 + $0xb0] sm:$0xff] %v352_v22  ;;  %355 = vst [vmem:[%s1417_s5 + $0xb8] sm:$0xff] %v354_v23  ;;  %v356_v24 = vld [vmem:[%s1409_s4 + $0x180] sm:$0xff]  ;;  %v358_v25 = vld [vmem:[%s1409_s4 + $0x190] sm:$0xff] }
  0x25   : > { %v360_v26 = vld [vmem:[%s1409_s4 + $0x1a0] sm:$0xff]  ;;  %357 = vst [vmem:[%s1417_s5 + $0xc0] sm:$0xff] %v356_v24  ;;  %359 = vst [vmem:[%s1417_s5 + $0xc8] sm:$0xff] %v358_v25  ;;  %v362_v27 = vld [vmem:[%s1409_s4 + $0x1b0] sm:$0xff] }
  0x26   : > { %361 = vst [vmem:[%s1417_s5 + $0xd0] sm:$0xff] %v360_v26  ;;  %v364_v28 = vld [vmem:[%s1409_s4 + $0x1c0] sm:$0xff]  ;;  %v366_v29 = vld [vmem:[%s1409_s4 + $0x1d0] sm:$0xff]  ;;  %363 = vst [vmem:[%s1417_s5 + $0xd8] sm:$0xff] %v362_v27 }
  0x27   : > { %365 = vst [vmem:[%s1417_s5 + $0xe0] sm:$0xff] %v364_v28  ;;  %367 = vst [vmem:[%s1417_s5 + $0xe8] sm:$0xff] %v366_v29  ;;  %v368_v30 = vld [vmem:[%s1409_s4 + $0x1e0] sm:$0xff]  ;;  %v370_v31 = vld [vmem:[%s1409_s4 + $0x1f0] sm:$0xff] }
  0x28   : > { %v372_v32 = vld [vmem:[%s1409_s4 + $0x200] sm:$0xff]  ;;  %369 = vst [vmem:[%s1417_s5 + $0xf0] sm:$0xff] %v368_v30  ;;  %371 = vst [vmem:[%s1417_s5 + $0xf8] sm:$0xff] %v370_v31  ;;  %v374_v33 = vld [vmem:[%s1409_s4 + $0x210] sm:$0xff] }
  0x29   : > { %373 = vst [vmem:[%s1417_s5 + $0x100] sm:$0xff] %v372_v32  ;;  %v376_v34 = vld [vmem:[%s1409_s4 + $0x220] sm:$0xff]  ;;  %v378_v35 = vld [vmem:[%s1409_s4 + $0x230] sm:$0xff]  ;;  %375 = vst [vmem:[%s1417_s5 + $0x108] sm:$0xff] %v374_v33 }
  0x2a   : > { %377 = vst [vmem:[%s1417_s5 + $0x110] sm:$0xff] %v376_v34  ;;  %379 = vst [vmem:[%s1417_s5 + $0x118] sm:$0xff] %v378_v35  ;;  %v380_v36 = vld [vmem:[%s1409_s4 + $0x240] sm:$0xff]  ;;  %v382_v37 = vld [vmem:[%s1409_s4 + $0x250] sm:$0xff] }
  0x2b   : > { %v384_v38 = vld [vmem:[%s1409_s4 + $0x260] sm:$0xff]  ;;  %381 = vst [vmem:[%s1417_s5 + $0x120] sm:$0xff] %v380_v36  ;;  %383 = vst [vmem:[%s1417_s5 + $0x128] sm:$0xff] %v382_v37  ;;  %v386_v39 = vld [vmem:[%s1409_s4 + $0x270] sm:$0xff] }
  0x2c   : > { %385 = vst [vmem:[%s1417_s5 + $0x130] sm:$0xff] %v384_v38  ;;  %v388_v40 = vld [vmem:[%s1409_s4 + $0x280] sm:$0xff]  ;;  %v390_v41 = vld [vmem:[%s1409_s4 + $0x290] sm:$0xff]  ;;  %387 = vst [vmem:[%s1417_s5 + $0x138] sm:$0xff] %v386_v39 }
  0x2d   : > { %389 = vst [vmem:[%s1417_s5 + $0x140] sm:$0xff] %v388_v40  ;;  %391 = vst [vmem:[%s1417_s5 + $0x148] sm:$0xff] %v390_v41  ;;  %v392_v42 = vld [vmem:[%s1409_s4 + $0x2a0] sm:$0xff]  ;;  %v394_v43 = vld [vmem:[%s1409_s4 + $0x2b0] sm:$0xff] }
  0x2e   : > { %v396_v44 = vld [vmem:[%s1409_s4 + $0x2c0] sm:$0xff]  ;;  %393 = vst [vmem:[%s1417_s5 + $0x150] sm:$0xff] %v392_v42  ;;  %395 = vst [vmem:[%s1417_s5 + $0x158] sm:$0xff] %v394_v43  ;;  %v398_v45 = vld [vmem:[%s1409_s4 + $0x2d0] sm:$0xff] }
  0x2f   : > { %397 = vst [vmem:[%s1417_s5 + $0x160] sm:$0xff] %v396_v44  ;;  %v400_v46 = vld [vmem:[%s1409_s4 + $0x2e0] sm:$0xff]  ;;  %v402_v47 = vld [vmem:[%s1409_s4 + $0x2f0] sm:$0xff]  ;;  %399 = vst [vmem:[%s1417_s5 + $0x168] sm:$0xff] %v398_v45 }
  0x30   : > { %401 = vst [vmem:[%s1417_s5 + $0x170] sm:$0xff] %v400_v46  ;;  %403 = vst [vmem:[%s1417_s5 + $0x178] sm:$0xff] %v402_v47 }
  0x31 PF: > { %p972_p11 = scmp.ge.s32.totalorder %s1318_s17, 1  ;;  %p414_p12 = scmp.lt.s32.totalorder %s1318_s17, 3 }
  0x33   : > { %p415_p13 = pnand %p972_p11, %p414_p12 }
  0x34   : > { %s1512_s6 = sand.u32 (!%p415_p13), 1, %s1302_s13   ;;  %v504_v48 = vld [vmem:[%s1756_s0 + $0x8] sm:$0xff] (!%p415_p13)  ;;  %v1320_v49 = vmov (!%p415_p13), 0.0|0.0   ;;  %vm1321_vm0 = vmmov (!%p415_p13), 0   ;;  %v1322_v50 = vmov (!%p415_p13), 0.0   ;;  %p470_p0 = scmp.lt.s32.totalorder (!%p415_p13), %s1310_s15, 1 }
  0x35   : > { %418 = sbr.rel (%p415_p13) target bundleno = 359 (0x167), region = 66  ;;  %1152 = vmatprep.subr.bf16.mxu1 (!%p415_p13), %v1320_v49  ;;  %642 = vmatprep.mubr.f32.mxu0 (!%p415_p13), %v504_v48  ;;  %s974_s5 = sshll.u32 (!%p415_p13), %s1310_s15, 7 }
  0x36   : > { %s1177_s9 = smul.u32 (!%p415_p13), 384, %s1512_s6  ;;  %1093 = vmatprep.mubr.msk.f32.mxu1 (!%p415_p13), %vm1321_vm0, %v1322_v50 }
  0x37   : > { %s1178_s29 = smul.u32 (!%p415_p13), 72, %s1512_s6 }
  0x38   : > { %s1521_s10 = scalar_lea.vmem (!%p415_p13), [#allocation3], %s1177_s9  ;;  %s1705_s9 = scalar_lea.hbm (!%p415_p13), %s1759_s3, %s974_s5 }
  0x39   : > { %v546_v51 = vld [vmem:[%s1521_s10 + $0x80] sm:$0xff] (!%p415_p13)  ;;  %v547_v52 = vld [vmem:[%s1521_s10 + $0x88] sm:$0xff] (!%p415_p13)  ;;  %v548_v60 = vld [vmem:[%s1521_s10 + $0x90] sm:$0xff] (!%p415_p13)  ;;  %s1681_s30 = scalar_lea.vmem (!%p415_p13), [#allocation4], %s1178_s29 }
  0x3a   : > { %v530_v53 = vld [vmem:[%s1521_s10] sm:$0xff] (!%p415_p13)  ;;  %v1120_v54 = vpack.c.bf16 (!%p415_p13), %v547_v52, %v546_v51  ;;  %v531_v55 = vld [vmem:[%s1521_s10 + $0x8] sm:$0xff] (!%p415_p13)  ;;  %v549_v61 = vld [vmem:[%s1521_s10 + $0x98] sm:$0xff] (!%p415_p13)  ;;  %s853_s4 = sshll.u32 (!%p415_p13), %s1681_s30, 4  ;;  %s1699_s4 = int_to_ptr.vmem [resolvable:$true] %s853_s4 }
  0x3b   : > { %v562_v56 = vld [vmem:[%s1521_s10 + $0x100] sm:$0xff] (!%p415_p13)  ;;  %v563_v57 = vld [vmem:[%s1521_s10 + $0x108] sm:$0xff] (!%p415_p13)  ;;  %v1122_v58 = vpack.c.bf16 (!%p415_p13), %v531_v55, %v530_v53  ;;  %v532_v62 = vld [vmem:[%s1521_s10 + $0x10] sm:$0xff] (!%p415_p13)  ;;  %v1124_v63 = vpack.c.bf16 (!%p415_p13), %v549_v61, %v548_v60  ;;  %s1240_s11 = scalar_lea.vmem (!%p415_p13), %s1699_s4, 1152 }
  0x3c   : > { %v1153_v59 = vpack.c.bf16 %v563_v57, %v562_v56  ;;  %1121 = vmatprep.subr.bf16.mxu0 %v1120_v54  ;;  %v533_v0 = vld [vmem:[%s1521_s10 + $0x18] sm:$0xff]  ;;  %v564_v1 = vld [vmem:[%s1521_s10 + $0x110] sm:$0xff]  ;;  %v550_v5 = vld [vmem:[%s1521_s10 + $0xa0] sm:$0xff]  ;;  %s471_s23 = scalar_select %p470_p0, %s1310_s15, 1 }
  0x3d   : > { %v565_v2 = vld [vmem:[%s1521_s10 + $0x118] sm:$0xff]  ;;  %1123 = vmatpush3.bf16.msra.mxu0 %v1122_v58  ;;  %v1126_v3 = vpack.c.bf16 %v533_v0, %v532_v62  ;;  %v551_v6 = vld [vmem:[%s1521_s10 + $0xa8] sm:$0xff]  ;;  %v534_v7 = vld [vmem:[%s1521_s10 + $0x20] sm:$0xff]  ;;  %p1241_p1 = scmp.ne.s32.totalorder %s1699_s4, %s1240_s11  ;;  %s1323_s15 = smov [#allocation4]  }
  0x3e   : > { %1154 = vmatpush3.bf16.msra.mxu1 %v1153_v59  ;;  %v1156_v4 = vpack.c.bf16 %v565_v2, %v564_v1  ;;  %1125 = vmatprep.subr.bf16.mxu0 %v1124_v63  ;;  %v1128_v8 = vpack.c.bf16 %v551_v6, %v550_v5  ;;  %v535_v9 = vld [vmem:[%s1521_s10 + $0x28] sm:$0xff]  ;;  %v566_v10 = vld [vmem:[%s1521_s10 + $0x120] sm:$0xff]  ;;  %v552_v12 = vld [vmem:[%s1521_s10 + $0xb0] sm:$0xff]  ;;  %s472_s28 = scalar_lea.vmem %s1758_s2, %s471_s23  ;;  %s1244_s18 = sshll.u32 %s1323_s15, 4  ;;  %s1245_s18 = int_to_ptr.vmem [resolvable:$false] %s1244_s18 }
  0x3f   : > { %1155 = vmatprep.subr.bf16.mxu1 %v1320_v49  ;;  %v567_v11 = vld [vmem:[%s1521_s10 + $0x128] sm:$0xff]  ;;  %v553_v13 = vld [vmem:[%s1521_s10 + $0xb8] sm:$0xff]  ;;  %v1130_v14 = vpack.c.bf16 %v535_v9, %v534_v7  ;;  %v536_v16 = vld [vmem:[%s1521_s10 + $0x30] sm:$0xff]  ;;  %p1242_p2 = pnand %p1241_p1, %p1386_p5  ;;  %s1246_s19 = scalar_lea.vmem %s1245_s18, 2304 }
  0x40   : > { %v1159_v15 = vpack.c.bf16 %v567_v11, %v566_v10  ;;  %v1132_v17 = vpack.c.bf16 %v553_v13, %v552_v12  ;;  %v537_v18 = vld [vmem:[%s1521_s10 + $0x38] sm:$0xff]  ;;  %v568_v19 = vld [vmem:[%s1521_s10 + $0x130] sm:$0xff]  ;;  %v554_v21 = vld [vmem:[%s1521_s10 + $0xc0] sm:$0xff]  ;;  %p1247_p4 = scmp.lt.s32.totalorder %s1699_s4, %s1245_s18  ;;  %p1248_p6 = scmp.lt.s32.totalorder %s1246_s19, %s1240_s11 }
  0x41   : > { %1127 = vmatpush3.bf16.msra.mxu0 %v1126_v3  ;;  %v569_v20 = vld [vmem:[%s1521_s10 + $0x138] sm:$0xff]  ;;  %v555_v22 = vld [vmem:[%s1521_s10 + $0xc8] sm:$0xff]  ;;  %v1134_v23 = vpack.c.bf16 %v537_v18, %v536_v16  ;;  %v538_v25 = vld [vmem:[%s1521_s10 + $0x40] sm:$0xff]  ;;  %p1243_p3 = pneg %p1242_p2 }
  0x42   : > { %1157 = vmatpush3.bf16.msra.mxu1 %v1156_v4  ;;  %1129 = vmatprep.subr.bf16.mxu0 %v1128_v8  ;;  %v1162_v24 = vpack.c.bf16 %v569_v20, %v568_v19  ;;  %v1136_v26 = vpack.c.bf16 %v555_v22, %v554_v21  ;;  %v539_v27 = vld [vmem:[%s1521_s10 + $0x48] sm:$0xff]  ;;  %v570_v28 = vld [vmem:[%s1521_s10 + $0x140] sm:$0xff]  ;;  %v556_v30 = vld [vmem:[%s1521_s10 + $0xd0] sm:$0xff]  ;;  %p1249_p7 = por %p1248_p6, %p1247_p4 }
  0x43   : > { %1158 = vmatprep.subr.bf16.mxu1 %v1320_v49  ;;  %v571_v29 = vld [vmem:[%s1521_s10 + $0x148] sm:$0xff]  ;;  %v557_v31 = vld [vmem:[%s1521_s10 + $0xd8] sm:$0xff]  ;;  %v1138_v32 = vpack.c.bf16 %v539_v27, %v538_v25  ;;  %v540_v34 = vld [vmem:[%s1521_s10 + $0x50] sm:$0xff] }
  0x44   : > { %v1165_v33 = vpack.c.bf16 %v571_v29, %v570_v28  ;;  %v1140_v35 = vpack.c.bf16 %v557_v31, %v556_v30  ;;  %v541_v36 = vld [vmem:[%s1521_s10 + $0x58] sm:$0xff]  ;;  %v572_v37 = vld [vmem:[%s1521_s10 + $0x150] sm:$0xff]  ;;  %v558_v39 = vld [vmem:[%s1521_s10 + $0xe0] sm:$0xff]  ;;  %p1250_p8 = pnand %p1249_p7, %p1243_p3 }
  0x45   : > { %1131 = vmatpush3.bf16.msra.mxu0 %v1130_v14  ;;  %v573_v38 = vld [vmem:[%s1521_s10 + $0x158] sm:$0xff]  ;;  %v559_v40 = vld [vmem:[%s1521_s10 + $0xe8] sm:$0xff]  ;;  %v1142_v41 = vpack.c.bf16 %v541_v36, %v540_v34  ;;  %v542_v43 = vld [vmem:[%s1521_s10 + $0x60] sm:$0xff] }
  0x46   : > { %1160 = vmatpush3.bf16.msra.mxu1 %v1159_v15  ;;  %1133 = vmatprep.subr.bf16.mxu0 %v1132_v17  ;;  %v1168_v42 = vpack.c.bf16 %v573_v38, %v572_v37  ;;  %v1144_v44 = vpack.c.bf16 %v559_v40, %v558_v39  ;;  %v543_v45 = vld [vmem:[%s1521_s10 + $0x68] sm:$0xff]  ;;  %v574_v46 = vld [vmem:[%s1521_s10 + $0x160] sm:$0xff]  ;;  %v560_v48 = vld [vmem:[%s1521_s10 + $0xf0] sm:$0xff] }
  0x47   : > { %1161 = vmatprep.subr.bf16.mxu1 %v1320_v49  ;;  %v575_v47 = vld [vmem:[%s1521_s10 + $0x168] sm:$0xff]  ;;  %v561_v51 = vld [vmem:[%s1521_s10 + $0xf8] sm:$0xff]  ;;  %v1146_v52 = vpack.c.bf16 %v543_v45, %v542_v43  ;;  %v544_v54 = vld [vmem:[%s1521_s10 + $0x70] sm:$0xff] }
  0x48   : > { %v1171_v53 = vpack.c.bf16 %v575_v47, %v574_v46  ;;  %v1148_v55 = vpack.c.bf16 %v561_v51, %v560_v48  ;;  %v545_v56 = vld [vmem:[%s1521_s10 + $0x78] sm:$0xff]  ;;  %v576_v57 = vld [vmem:[%s1521_s10 + $0x170] sm:$0xff]  ;;  %v503_v61 = vld [vmem:[%s1756_s0] sm:$0xff] }
  0x49   : > { %1135 = vmatpush3.bf16.msra.mxu0 %v1134_v23  ;;  %v577_v58 = vld [vmem:[%s1521_s10 + $0x178] sm:$0xff]  ;;  %v1150_v59 = vpack.c.bf16 %v545_v56, %v544_v54  ;;  %v505_v62 = vld [vmem:[%s1756_s0 + $0x10] sm:$0xff]  ;;  %v507_v63 = vld [vmem:[%s1756_s0 + $0x20] sm:$0xff]  ;;  %s838_s10 = scalar_lea.sflag [#allocation5], %s1512_s6 }
  0x4a   : > { %1163 = vmatpush3.bf16.msra.mxu1 %v1162_v24  ;;  %1137 = vmatprep.subr.bf16.mxu0 %v1136_v26  ;;  %v1174_v60 = vpack.c.bf16 %v577_v58, %v576_v57  ;;  %v508_v0 = vld [vmem:[%s1756_s0 + $0x28] sm:$0xff]  ;;  %v510_v1 = vld [vmem:[%s1756_s0 + $0x38] sm:$0xff]  ;;  %v509_v2 = vld [vmem:[%s1756_s0 + $0x30] sm:$0xff] }
  0x4b   : > { %1164 = vmatprep.subr.bf16.mxu1 %v1320_v49  ;;  %v511_v3 = vld [vmem:[%s1756_s0 + $0x40] sm:$0xff]  ;;  %v513_v4 = vld [vmem:[%s1756_s0 + $0x50] sm:$0xff]  ;;  %v512_v5 = vld [vmem:[%s1756_s0 + $0x48] sm:$0xff] }
  0x4c   : > { %v514_v6 = vld [vmem:[%s1756_s0 + $0x58] sm:$0xff]  ;;  %v516_v7 = vld [vmem:[%s1756_s0 + $0x68] sm:$0xff]  ;;  %v515_v8 = vld [vmem:[%s1756_s0 + $0x60] sm:$0xff] }
  0x4d   : > { %1139 = vmatpush3.bf16.msra.mxu0 %v1138_v32  ;;  %v517_v9 = vld [vmem:[%s1756_s0 + $0x70] sm:$0xff]  ;;  %v519_v10 = vld [vmem:[%s1756_s0 + $0x80] sm:$0xff]  ;;  %v518_v11 = vld [vmem:[%s1756_s0 + $0x78] sm:$0xff] }
  0x4e   : > { %1166 = vmatpush3.bf16.msra.mxu1 %v1165_v33  ;;  %1141 = vmatprep.subr.bf16.mxu0 %v1140_v35  ;;  %v520_v12 = vld [vmem:[%s1756_s0 + $0x88] sm:$0xff]  ;;  %v522_v13 = vld [vmem:[%s1756_s0 + $0x98] sm:$0xff]  ;;  %v521_v14 = vld [vmem:[%s1756_s0 + $0x90] sm:$0xff] }
  0x4f   : > { %1167 = vmatprep.subr.bf16.mxu1 %v1320_v49  ;;  %v523_v15 = vld [vmem:[%s1756_s0 + $0xa0] sm:$0xff]  ;;  %v525_v16 = vld [vmem:[%s1756_s0 + $0xb0] sm:$0xff]  ;;  %v524_v17 = vld [vmem:[%s1756_s0 + $0xa8] sm:$0xff] }
  0x50   : > { %v526_v18 = vld [vmem:[%s1756_s0 + $0xb8] sm:$0xff]  ;;  %v528_v19 = vld [vmem:[%s1756_s0 + $0xc8] sm:$0xff]  ;;  %v527_v20 = vld [vmem:[%s1756_s0 + $0xc0] sm:$0xff] }
  0x51   : > { %1143 = vmatpush3.bf16.msra.mxu0 %v1142_v41  ;;  %v529_v21 = vld [vmem:[%s1756_s0 + $0xd0] sm:$0xff]  ;;  %v1678_v27 = vld [vmem:[%s472_s28] ss:$0 sm:$0xff] }
  0x52   : > { %1169 = vmatpush3.bf16.msra.mxu1 %v1168_v42  ;;  %1145 = vmatprep.subr.bf16.mxu0 %v1144_v44 }
  0x53   : > { %1170 = vmatprep.subr.bf16.mxu1 %v1320_v49 }
  0x55   : > { %1147 = vmatpush3.bf16.msra.mxu0 %v1146_v52 }
  0x56   : > { %1172 = vmatpush3.bf16.msra.mxu1 %v1171_v53  ;;  %1149 = vmatprep.subr.bf16.mxu0 %v1148_v55 }
  0x57   : > { %1173 = vmatprep.subr.bf16.mxu1 %v1320_v49  ;;  %v506_v49 = vld [vmem:[%s1756_s0 + $0x18] sm:$0xff] }
  0x59   : > { %1151 = vmatpush3.bf16.msra.mxu0 %v1150_v59 }
  0x5a   : > { %1175 = vmatpush3.bf16.msra.mxu1 %v1174_v60 }
  0x5c   : > { %643 = vmatmul.mubr.f32.vlgmr.msra.gmra.mrb[0].mxu0 %v503_v61 }
  0x5d   : > { %1094 = vmatmul.mubr.f32.vlgmr.msra.gmra.mrb[0].mxu1 %v505_v62  ;;  %647 = vmatprep.mubr.f32.mxu0 %v507_v63 }
  0x5e   : > { %1096 = vmatprep.mubr.msk.f32.mxu1 %vm1321_vm0, %v1322_v50 }
  0x60   : > { %648 = vmatmul.mubr.f32.gmra.mrb[2].mxu0 %v506_v49 }
  0x61   : > { %1097 = vmatmul.mubr.f32.gmra.mrb[2].mxu1 %v508_v0  ;;  %652 = vmatprep.mubr.f32.mxu0 %v510_v1 }
  0x62   : > { %1099 = vmatprep.mubr.msk.f32.mxu1 %vm1321_vm0, %v1322_v50 }
  0x64   : > { %653 = vmatmul.mubr.f32.gmra.mrb[4].mxu0 %v509_v2 }
  0x65   : > { %1100 = vmatmul.mubr.f32.gmra.mrb[4].mxu1 %v511_v3  ;;  %657 = vmatprep.mubr.f32.mxu0 %v513_v4 }
  0x66   : > { %1102 = vmatprep.mubr.msk.f32.mxu1 %vm1321_vm0, %v1322_v50 }
  0x68   : > { %658 = vmatmul.mubr.f32.gmra.mrb[6].mxu0 %v512_v5 }
  0x69   : > { %1103 = vmatmul.mubr.f32.gmra.mrb[6].mxu1 %v514_v6  ;;  %662 = vmatprep.mubr.f32.mxu0 %v516_v7 }
  0x6a   : > { %1105 = vmatprep.mubr.msk.f32.mxu1 %vm1321_vm0, %v1322_v50 }
  0x6c   : > { %663 = vmatmul.mubr.f32.gmra.mrb[8].mxu0 %v515_v8 }
  0x6d   : > { %1106 = vmatmul.mubr.f32.gmra.mrb[8].mxu1 %v517_v9  ;;  %667 = vmatprep.mubr.f32.mxu0 %v519_v10 }
  0x6e   : > { %1108 = vmatprep.mubr.msk.f32.mxu1 %vm1321_vm0, %v1322_v50 }
  0x70   : > { %668 = vmatmul.mubr.f32.gmra.mrb[10].mxu0 %v518_v11 }
  0x71   : > { %1109 = vmatmul.mubr.f32.gmra.mrb[10].mxu1 %v520_v12  ;;  %672 = vmatprep.mubr.f32.mxu0 %v522_v13 }
  0x72   : > { %1111 = vmatprep.mubr.msk.f32.mxu1 %vm1321_vm0, %v1322_v50 }
  0x74   : > { %673 = vmatmul.mubr.f32.gmra.mrb[12].mxu0 %v521_v14 }
  0x75   : > { %1112 = vmatmul.mubr.f32.gmra.mrb[12].mxu1 %v523_v15  ;;  %677 = vmatprep.mubr.f32.mxu0 %v525_v16 }
  0x76   : > { %1114 = vmatprep.mubr.msk.f32.mxu1 %vm1321_vm0, %v1322_v50 }
  0x78   : > { %678 = vmatmul.mubr.f32.gmra.mrb[14].mxu0 %v524_v17 }
  0x79   : > { %1115 = vmatmul.mubr.f32.gmra.mrb[14].mxu1 %v526_v18  ;;  %682 = vmatprep.mubr.f32.mxu0 %v528_v19 }
  0x7a   : > { %1117 = vmatprep.mubr.msk.f32.mxu1 %vm1321_vm0, %v1322_v50 }
  0x7c   : > { %683 = vmatmul.mubr.f32.gmra.mrb[16].mxu0 %v527_v20 }
  0x7d   : > { %1118 = vmatmul.mubr.f32.gmra.mrb[16].mxu1 %v529_v21 }
 0x12f   : > { %v1009_v22 = vpop.f32.mrb[0].mxu0 }
 0x130   : > { %v754_v23 = vpop.f32.mrb[0].mxu1  ;;  %v1010_v24 = vpop.f32.mrb[1].mxu0 }
 0x131   : > { %v1095_v25 = vpop.f32.mrb[1].mxu1  ;;  %v1011_v26 = vadd.f32 %v1010_v24, %v1009_v22 }
 0x133   : > { %v755_v50 = vadd.f32 %v1011_v26, %v754_v23  ;;  %v1012_v28 = vpop.f32.mrb[2].mxu0 }
 0x134   : > { %v759_v29 = vpop.f32.mrb[2].mxu1  ;;  %v1013_v30 = vpop.f32.mrb[3].mxu0 }
 0x135   : > { %v1098_v31 = vpop.f32.mrb[3].mxu1  ;;  %v798_v32 = vadd.f32 %v1678_v27, %v755_v50  ;;  %v1014_v33 = vadd.f32 %v1013_v30, %v1012_v28 }
 0x137   : > { %828 = vst [vmem:[%s1681_s30] sm:$0xff] %v798_v32  ;;  %v760_v34 = vadd.f32 %v1014_v33, %v759_v29  ;;  %v1015_v35 = vpop.f32.mrb[4].mxu0 }
 0x138   : > { %v764_v36 = vpop.f32.mrb[4].mxu1  ;;  %v1016_v37 = vpop.f32.mrb[5].mxu0 }
 0x139   : > { %v1101_v38 = vpop.f32.mrb[5].mxu1  ;;  %v799_v39 = vadd.f32 %v1678_v27, %v760_v34  ;;  %v1017_v40 = vadd.f32 %v1016_v37, %v1015_v35 }
 0x13b   : > { %829 = vst [vmem:[%s1681_s30 + $0x8] sm:$0xff] %v799_v39  ;;  %v765_v41 = vadd.f32 %v1017_v40, %v764_v36  ;;  %v1018_v42 = vpop.f32.mrb[6].mxu0 }
 0x13c   : > { %v769_v43 = vpop.f32.mrb[6].mxu1  ;;  %v1019_v44 = vpop.f32.mrb[7].mxu0 }
 0x13d   : > { %v1104_v45 = vpop.f32.mrb[7].mxu1  ;;  %v800_v46 = vadd.f32 %v1678_v27, %v765_v41  ;;  %v1020_v47 = vadd.f32 %v1019_v44, %v1018_v42 }
 0x13f   : > { %830 = vst [vmem:[%s1681_s30 + $0x10] sm:$0xff] %v800_v46  ;;  %v770_v48 = vadd.f32 %v1020_v47, %v769_v43  ;;  %v1021_v51 = vpop.f32.mrb[8].mxu0 }
 0x140   : > { %v774_v52 = vpop.f32.mrb[8].mxu1  ;;  %v1022_v53 = vpop.f32.mrb[9].mxu0 }
 0x141   : > { %v1107_v54 = vpop.f32.mrb[9].mxu1  ;;  %v801_v55 = vadd.f32 %v1678_v27, %v770_v48  ;;  %v1023_v56 = vadd.f32 %v1022_v53, %v1021_v51 }
 0x143   : > { %831 = vst [vmem:[%s1681_s30 + $0x18] sm:$0xff] %v801_v55  ;;  %v775_v57 = vadd.f32 %v1023_v56, %v774_v52  ;;  %v1024_v58 = vpop.f32.mrb[10].mxu0 }
 0x144   : > { %v779_v59 = vpop.f32.mrb[10].mxu1  ;;  %v1025_v60 = vpop.f32.mrb[11].mxu0 }
 0x145   : > { %v1110_v61 = vpop.f32.mrb[11].mxu1  ;;  %v802_v62 = vadd.f32 %v1678_v27, %v775_v57  ;;  %v1026_v63 = vadd.f32 %v1025_v60, %v1024_v58 }
 0x147   : > { %832 = vst [vmem:[%s1681_s30 + $0x20] sm:$0xff] %v802_v62  ;;  %v780_v49 = vadd.f32 %v1026_v63, %v779_v59  ;;  %v1027_v0 = vpop.f32.mrb[12].mxu0 }
 0x148   : > { %v784_v1 = vpop.f32.mrb[12].mxu1  ;;  %v1028_v2 = vpop.f32.mrb[13].mxu0 }
 0x149   : > { %v1113_v3 = vpop.f32.mrb[13].mxu1  ;;  %v803_v4 = vadd.f32 %v1678_v27, %v780_v49  ;;  %v1029_v5 = vadd.f32 %v1028_v2, %v1027_v0 }
 0x14b   : > { %833 = vst [vmem:[%s1681_s30 + $0x28] sm:$0xff] %v803_v4  ;;  %v785_v6 = vadd.f32 %v1029_v5, %v784_v1  ;;  %v1030_v7 = vpop.f32.mrb[14].mxu0 }
 0x14c   : > { %v789_v8 = vpop.f32.mrb[14].mxu1  ;;  %v1031_v9 = vpop.f32.mrb[15].mxu0 }
 0x14d   : > { %v1116_v10 = vpop.f32.mrb[15].mxu1  ;;  %v804_v11 = vadd.f32 %v1678_v27, %v785_v6  ;;  %v1032_v12 = vadd.f32 %v1031_v9, %v1030_v7 }
 0x14f   : > { %834 = vst [vmem:[%s1681_s30 + $0x30] sm:$0xff] %v804_v11  ;;  %v790_v13 = vadd.f32 %v1032_v12, %v789_v8  ;;  %v1033_v14 = vpop.f32.mrb[16].mxu0 }
 0x150   : > { %v794_v15 = vpop.f32.mrb[16].mxu1  ;;  %v1034_v16 = vpop.f32.mrb[17].mxu0 }
 0x151   : > { %v1119_v17 = vpop.f32.mrb[17].mxu1  ;;  %v805_v18 = vadd.f32 %v1678_v27, %v790_v13  ;;  %v1035_v19 = vadd.f32 %v1034_v16, %v1033_v14 }
 0x153   : > { %835 = vst [vmem:[%s1681_s30 + $0x38] sm:$0xff] %v805_v18  ;;  %v795_v20 = vadd.f32 %v1035_v19, %v794_v15 }
 0x155   : > { %v806_v21 = vadd.f32 %v1678_v27, %v795_v20 }
 0x157   : > { %836 = vst [vmem:[%s1681_s30 + $0x40] sm:$0xff] %v806_v21 }
 0x158   : > { %1253 = shalt.err (!%p1250_p8)
}
 0x159   : > { %s1254_s21 = scalar_lea.hbm %s1705_s9, 1152  ;;  %s1258_s27 = scalar_lea.hbm %s1759_s3, 2304 }
 0x15a   : > { %p1255_p11 = scmp.ne.s32.totalorder %s1705_s9, %s1254_s21  ;;  %p1259_p0 = scmp.lt.u32.totalorder %s1705_s9, %s1759_s3 }
 0x15b   : > { %p1260_p1 = scmp.lt.u32.totalorder %s1258_s27, %s1254_s21  ;;  %p1262_p3 = scmp.lt.u32.totalorder %s1254_s21, %s1705_s9 }
 0x15c   : > { %p1256_p12 = pnand %p1255_p11, %p1386_p5 }
 0x15d   : > { %p1261_p2 = por %p1260_p1, %p1259_p0 }
 0x15e   : > { %p1257_p13 = pneg %p1256_p12 }
 0x15f   : > { %p1263_p4 = por %p1262_p3, %p1261_p2 }
 0x161   : > { %p1264_p6 = pnand %p1263_p4, %p1257_p13 }
 0x163   : > { %1267 = shalt.err (!%p1264_p6)
}
 0x164   : > { %s1324_s30 = smov 128   ;;  %s1325_s5 = smov 256  }
 0x165   : > { %s1326_s7 = smov 8  }
 0x166   : > { %1179 = dma.vmem_to_hbm [thread:$0]  (%p1386_p5), %s1699_s4, 1152, %s1705_s9, %s838_s10, %s1324_s30, %s1325_s5, %s1326_s7  }
 0x167 PF: > { %s868_s8 = sand.u32 1, %s1298_s12   ;;  %p1182_p7 = pnand %p970_p10, %p1397_p9 }
 0x168   : > { %s869_s11 = scalar_lea.sflag [#allocation5], %s868_s8 }
 0x169   : > { %1293 = dma.done.wait (!%p1182_p7), %s869_s11, 1152  }
 0x16a   : > { %1295 = vsyncadd (!%p1182_p7), %s869_s11, 4294966144  ;;  %s16_s17 = sadd.s32 1, %s1318_s17   ;;  %s1762_s12 = smov %s1302_s13 }
 0x16b   : > { %p13_p8 = scmp.ge.s32.totalorder %s16_s17, 4   ;;  %s1763_s13 = smov %s1306_s14 }
 0x16c   : > { %s1764_s14 = smov %s1395_s24  ;;  %s1765_s15 = smov %s1314_s16 }
 0x16d   : > { %s1766_s16 = smov %s1768_s20  ;;  %15 = sbr.rel (!%p13_p8) target bundleno = 4 (0x4), region = 124 }
 0x174   :  { %874 = vsyncpa [#allocation5], 1 }
 0x175   :  { %876 = vsyncpa [#allocation5 + $0x1], 1 }

</bundles_post_ra>
